<compile_context>
chip_gen: v7x
topology: tpu7x:2x2x1
jax: 0.10.0
libtpu: 0.0.40
codegen_flags: <defaults>
</compile_context>

<pallas_src>
import functools

import numpy as np
import jax
import jax.numpy as jnp
from jax import lax
from jax.experimental import pallas as pl
from jax.experimental.pallas import tpu as pltpu


# --------------------------------------------------------------------------
# Fused Pallas kernel: vertex projection + bilinear sampling of every feature
# level, written as ONE lane-dense padded output tile per grid step.
# --------------------------------------------------------------------------
def _gprojection_fused_kernel(inputs_ref, *rest, mesh_pos, camera_f,
                              camera_c_offset, inv_half_res, levels,
                              c_total, c_pad, hw_chunk, matmul_dtype):
    # inputs_ref : (1, TN, 3)
    # rest       : one (1, H_i*W_i, C_i) feature ref per level, then out_ref
    # out_ref    : (1, TN, c_pad)
    out_ref = rest[-1]
    feat_refs = rest[:-1]

    tn = out_ref.shape[1]
    xyz = inputs_ref[0]                              # [TN, 3]

    pos_x = xyz[:, 0:1] + mesh_pos[0]                # [TN, 1]
    pos_y = xyz[:, 1:2] + mesh_pos[1]
    pos_z = xyz[:, 2:3] + mesh_pos[2]                # bound == 0 -> identity

    # Single exact reciprocal feeds both coordinates (approx=True would break
    # the 1e-4 tolerance once amplified by camera_f / half_resolution).
    inv_z = 1.0 / pos_z

    w = (-camera_f[0]) * (pos_x * inv_z) + camera_c_offset[0]
    h = camera_f[1] * (pos_y * inv_z) + camera_c_offset[1]
    w = jnp.clip(w * inv_half_res[0], -1.0, 1.0)     # normalized grid x
    h = jnp.clip(h * inv_half_res[1], -1.0, 1.0)     # normalized grid y

    if matmul_dtype == jnp.float32:
        prec = lax.Precision.HIGHEST                 # keep f32 matmul exact-ish
    else:
        prec = lax.Precision.DEFAULT

    pieces = [xyz]                                   # torch.cat feats[0] = xyz
    for feat_ref, (H, W, C) in zip(feat_refs, levels):
        hw = H * W
        # grid_sample un-normalization (align_corners=False).
        x_pix = ((w + 1.0) * W - 1.0) * 0.5          # [TN, 1]
        y_pix = ((h + 1.0) * H - 1.0) * 0.5

        acc = jnp.zeros((tn, C), jnp.float32)
        for start in range(0, hw, hw_chunk):
            size = min(hw_chunk, hw - start)
            # Flat pixel index as a [1, size] lane row (hoisted off N).
            k = (lax.broadcasted_iota(jnp.int32, (1, size), 1)
                 + start).astype(jnp.float32)
            hi = jnp.floor(k / float(W))             # pixel row (exact fp32 div)
            wi = k - hi * float(W)                   # pixel col
            # Separable tent weights; out-of-range bilinear corners never lie
            # in [0,H)x[0,W) so they get zero weight == padding_mode='zeros'.
            wy = jnp.maximum(0.0, 1.0 - jnp.abs(y_pix - hi))   # [TN, size]
            wx = jnp.maximum(0.0, 1.0 - jnp.abs(x_pix - wi))   # [TN, size]
            m = (wy * wx).astype(matmul_dtype)
            f = feat_ref[0, start:start + size, :].astype(matmul_dtype)
            # Bilinear sample as a dense one-hot matmul on the MXU.
            acc = acc + jnp.dot(m, f, preferred_element_type=jnp.float32,
                                precision=prec)
        pieces.append(acc)

    if c_pad > c_total:
        pieces.append(jnp.zeros((tn, c_pad - c_total), jnp.float32))

    # One unmasked, 128-lane-dense store of the whole output tile.
    out_ref[0] = jnp.concatenate(pieces, axis=-1)


def _choose_tn(n):
    """Largest tile of N that keeps blocks (8,128)-friendly and divides N."""
    for cand in (512, 256, 128):
        if n % cand == 0:
            return cand
    return n


# --------------------------------------------------------------------------
# Wrapper: one fused pallas_call for all feature levels.
# --------------------------------------------------------------------------
def gprojection_forward(resolution, img_features, inputs, *,
                        mesh_pos, camera_f, camera_c,
                        matmul_dtype=jnp.float32):
    """Mirrors GProjection.forward (bound=0, tensorflow_compatible=False)."""
    B, N, _ = inputs.shape
    if not img_features:
        return inputs

    half_res = (np.asarray(resolution, np.float32) - 1.0) / 2.0
    cc_off = np.asarray(camera_c, np.float32) - half_res

    levels = []
    feat_slabs = []
    for f in img_features:
        _, C, H, W = f.shape
        levels.append((H, W, C))
        # NCHW -> [B, H*W, C] channels-last slab.  Remaining XLA glue; a
        # channels-last producer would remove this HBM round-trip.
        feat_slabs.append(jnp.transpose(f, (0, 2, 3, 1)).reshape(B, H * W, C))

    c_total = 3 + sum(C for (_, _, C) in levels)
    c_pad = ((c_total + 127) // 128) * 128           # lane-dense output slab
    tn = _choose_tn(N)
    hw_chunk = 2048                                  # bounds [TN, HW] weights

    kern = functools.partial(
        _gprojection_fused_kernel,
        mesh_pos=tuple(float(v) for v in mesh_pos),
        camera_f=tuple(float(v) for v in camera_f),
        camera_c_offset=tuple(float(v) for v in cc_off),
        inv_half_res=tuple(float(1.0 / v) for v in half_res),
        levels=tuple(levels),
        c_total=c_total,
        c_pad=c_pad,
        hw_chunk=hw_chunk,
        matmul_dtype=matmul_dtype)

    in_specs = [pl.BlockSpec((1, tn, 3), lambda b, n: (b, n, 0))]
    for (H, W, C) in levels:
        # n-invariant index_map: each level is DMA'd once per batch element.
        in_specs.append(pl.BlockSpec((1, H * W, C), lambda b, n: (b, 0, 0)))

    # VMEM budget derived from actual tile sizes (v7x: 64 MiB physical).
    max_hw = max(H * W for (H, W, _) in levels)
    est = 2 * tn * 3 * 4 + 2 * tn * c_pad * 4
    for (H, W, C) in levels:
        est += 2 * H * W * C * 4                     # double-buffered slabs
    est += 4 * tn * min(max_hw, hw_chunk) * 4        # weight-matrix working set
    vmem_limit = int(min(64 * 2 ** 20, max(32 * 2 ** 20, 2 * est)))

    out = pl.pallas_call(
        kern,
        out_shape=jax.ShapeDtypeStruct((B, N, c_pad), jnp.float32),
        grid_spec=pltpu.PrefetchScalarGridSpec(
            num_scalar_prefetch=0,
            grid=(B, N // tn),
            in_specs=in_specs,
            out_specs=pl.BlockSpec((1, tn, c_pad), lambda b, n: (b, n, 0))),
        compiler_params=pltpu.CompilerParams(
            dimension_semantics=("parallel", "parallel"),
            vmem_limit_bytes=vmem_limit),
    )(inputs, *feat_slabs)

    return out[:, :, :c_total]


# --------------------------------------------------------------------------
# Pure-JAX reference (gather-based grid_sample) for correctness checking.
# --------------------------------------------------------------------------
def _grid_sample_ref(feat, grid):
    # feat [B,C,H,W], grid [B,N,2] with (x, y) in [-1, 1]
    B, C, H, W = feat.shape
    x = ((grid[..., 0] + 1.0) * W - 1.0) / 2.0
    y = ((grid[..., 1] + 1.0) * H - 1.0) / 2.0
    x0 = jnp.floor(x)
    y0 = jnp.floor(y)

    def corner(xi, yi, wgt):
        valid = ((xi >= 0) & (xi < W) & (yi >= 0) & (yi < H)).astype(feat.dtype)
        xc = jnp.clip(xi, 0, W - 1).astype(jnp.int32)
        yc = jnp.clip(yi, 0, H - 1).astype(jnp.int32)
        v = jax.vmap(lambda f, yy, xx: f[:, yy, xx])(feat, yc, xc)  # [B, C, N]
        return v * (wgt * valid)[:, None, :]

    out = (corner(x0, y0, (x0 + 1 - x) * (y0 + 1 - y))
           + corner(x0 + 1, y0, (x - x0) * (y0 + 1 - y))
           + corner(x0, y0 + 1, (x0 + 1 - x) * (y - y0))
           + corner(x0 + 1, y0 + 1, (x - x0) * (y - y0)))
    return jnp.transpose(out, (0, 2, 1))                            # [B, N, C]


def _forward_ref(resolution, img_features, inputs, *,
                 mesh_pos, camera_f, camera_c):
    half_res = (np.asarray(resolution, np.float32) - 1.0) / 2.0
    cc_off = np.asarray(camera_c, np.float32) - half_res
    positions = inputs + jnp.asarray(mesh_pos, jnp.float32)
    w = -camera_f[0] * (positions[:, :, 0] / positions[:, :, 2]) + cc_off[0]
    h = camera_f[1] * (positions[:, :, 1] / positions[:, :, 2]) + cc_off[1]
    w = jnp.clip(w / half_res[0], -1.0, 1.0)
    h = jnp.clip(h / half_res[1], -1.0, 1.0)
    grid = jnp.stack([w, h], axis=-1)
    feats = [inputs]
    for img_feature in img_features:
        feats.append(_grid_sample_ref(img_feature, grid))
    return jnp.concatenate(feats, axis=2)


# --------------------------------------------------------------------------
if __name__ == "__main__":
    # Deterministic synthetic setup (module __init__ args are plain constants)
    mesh_pos = (0.0, 0.0, -0.8)
    camera_f = (248.0, 248.0)
    camera_c = (111.5, 111.5)
    resolution = np.array([224.0, 224.0], dtype=np.float32)

    B, N = 2, 8
    key = jax.random.PRNGKey(0)
    k_in, k_f1, k_f2 = jax.random.split(key, 3)

    inputs = 0.2 * jax.random.normal(k_in, (B, N, 3), dtype=jnp.float32)
    img_features = [
        jax.random.normal(k_f1, (B, 4, 16, 16), dtype=jnp.float32),
        jax.random.normal(k_f2, (B, 8, 8, 8), dtype=jnp.float32),
    ]

    out = gprojection_forward(resolution, img_features, inputs,
                              mesh_pos=mesh_pos, camera_f=camera_f,
                              camera_c=camera_c)
    out = jax.block_until_ready(out)

    assert out.shape == (B, N, 3 + 4 + 8), out.shape

    ref = _forward_ref(resolution, img_features, inputs,
                       mesh_pos=mesh_pos, camera_f=camera_f,
                       camera_c=camera_c)
    np.testing.assert_allclose(np.asarray(out), np.asarray(ref),
                               atol=1e-4, rtol=1e-4)

    print("KERNEL_OK")
</pallas_src>

<mosaic_0001>
module attributes {stable_mosaic.version = 11 : i64} {
  func.func @_gprojection_fused_kernel(%arg0: i32, %arg1: i32, %arg2: memref<1x8x3xf32, #tpu.memory_space<vmem>>, %arg3: memref<1x256x4xf32, #tpu.memory_space<vmem>>, %arg4: memref<1x64x8xf32, #tpu.memory_space<vmem>>, %arg5: memref<1x8x128xf32, #tpu.memory_space<vmem>>) attributes {dimension_semantics = [#tpu.dimension_semantics<parallel>, #tpu.dimension_semantics<parallel>], iteration_bounds = array<i64: 2, 1>, scalar_prefetch = 0 : i64, scratch_operands = 0 : i64, tpu.core_type = #tpu.core_type<tc>, window_params = [{transform_indices = @transform_0, window_bounds = array<i64: 1, 8, 3>}, {transform_indices = @transform_1, window_bounds = array<i64: 1, 256, 4>}, {transform_indices = @transform_2, window_bounds = array<i64: 1, 64, 8>}, {transform_indices = @transform_3, window_bounds = array<i64: 1, 8, 128>}]} {
    %c0 = arith.constant 0 : index
    %c0_0 = arith.constant 0 : index
    %c0_1 = arith.constant 0 : index
    %0 = vector.load %arg2[%c0, %c0_0, %c0_1] : memref<1x8x3xf32, #tpu.memory_space<vmem>>, vector<1x8x3xf32>
    %1 = vector.shape_cast %0 : vector<1x8x3xf32> to vector<8x3xf32>
    %2 = vector.extract_strided_slice %1 {offsets = [0, 0], sizes = [8, 1], strides = [1, 1]} : vector<8x3xf32> to vector<8x1xf32>
    %cst = arith.constant 0.000000e+00 : f32
    %3 = vector.broadcast %cst : f32 to vector<8x1xf32>
    %4 = arith.addf %2, %3 : vector<8x1xf32>
    %5 = vector.extract_strided_slice %1 {offsets = [0, 1], sizes = [8, 1], strides = [1, 1]} : vector<8x3xf32> to vector<8x1xf32>
    %cst_2 = arith.constant 0.000000e+00 : f32
    %6 = vector.broadcast %cst_2 : f32 to vector<8x1xf32>
    %7 = arith.addf %5, %6 : vector<8x1xf32>
    %8 = vector.extract_strided_slice %1 {offsets = [0, 2], sizes = [8, 1], strides = [1, 1]} : vector<8x3xf32> to vector<8x1xf32>
    %cst_3 = arith.constant -8.000000e-01 : f32
    %9 = vector.broadcast %cst_3 : f32 to vector<8x1xf32>
    %10 = arith.addf %8, %9 : vector<8x1xf32>
    %cst_4 = arith.constant 1.000000e+00 : f32
    %11 = vector.broadcast %cst_4 : f32 to vector<8x1xf32>
    %12 = arith.divf %11, %10 : vector<8x1xf32>
    %13 = arith.mulf %4, %12 : vector<8x1xf32>
    %cst_5 = arith.constant -2.480000e+02 : f32
    %14 = vector.broadcast %cst_5 : f32 to vector<8x1xf32>
    %15 = arith.mulf %14, %13 : vector<8x1xf32>
    %cst_6 = arith.constant 0.000000e+00 : f32
    %16 = vector.broadcast %cst_6 : f32 to vector<8x1xf32>
    %17 = arith.addf %15, %16 : vector<8x1xf32>
    %18 = arith.mulf %7, %12 : vector<8x1xf32>
    %cst_7 = arith.constant 2.480000e+02 : f32
    %19 = vector.broadcast %cst_7 : f32 to vector<8x1xf32>
    %20 = arith.mulf %19, %18 : vector<8x1xf32>
    %cst_8 = arith.constant 0.000000e+00 : f32
    %21 = vector.broadcast %cst_8 : f32 to vector<8x1xf32>
    %22 = arith.addf %20, %21 : vector<8x1xf32>
    %cst_9 = arith.constant 8.968610e-03 : f32
    %23 = vector.broadcast %cst_9 : f32 to vector<8x1xf32>
    %24 = arith.mulf %17, %23 : vector<8x1xf32>
    %cst_10 = arith.constant -1.000000e+00 : f32
    %cst_11 = arith.constant 1.000000e+00 : f32
    %25 = vector.broadcast %cst_10 : f32 to vector<8x1xf32>
    %26 = arith.maximumf %25, %24 : vector<8x1xf32>
    %27 = vector.broadcast %cst_11 : f32 to vector<8x1xf32>
    %28 = arith.minimumf %27, %26 : vector<8x1xf32>
    %cst_12 = arith.constant 8.968610e-03 : f32
    %29 = vector.broadcast %cst_12 : f32 to vector<8x1xf32>
    %30 = arith.mulf %22, %29 : vector<8x1xf32>
    %cst_13 = arith.constant -1.000000e+00 : f32
    %cst_14 = arith.constant 1.000000e+00 : f32
    %31 = vector.broadcast %cst_13 : f32 to vector<8x1xf32>
    %32 = arith.maximumf %31, %30 : vector<8x1xf32>
    %33 = vector.broadcast %cst_14 : f32 to vector<8x1xf32>
    %34 = arith.minimumf %33, %32 : vector<8x1xf32>
    %cst_15 = arith.constant 1.000000e+00 : f32
    %35 = vector.broadcast %cst_15 : f32 to vector<8x1xf32>
    %36 = arith.addf %28, %35 : vector<8x1xf32>
    %cst_16 = arith.constant 1.600000e+01 : f32
    %37 = vector.broadcast %cst_16 : f32 to vector<8x1xf32>
    %38 = arith.mulf %36, %37 : vector<8x1xf32>
    %cst_17 = arith.constant 1.000000e+00 : f32
    %39 = vector.broadcast %cst_17 : f32 to vector<8x1xf32>
    %40 = arith.subf %38, %39 : vector<8x1xf32>
    %cst_18 = arith.constant 5.000000e-01 : f32
    %41 = vector.broadcast %cst_18 : f32 to vector<8x1xf32>
    %42 = arith.mulf %40, %41 : vector<8x1xf32>
    %cst_19 = arith.constant 1.000000e+00 : f32
    %43 = vector.broadcast %cst_19 : f32 to vector<8x1xf32>
    %44 = arith.addf %34, %43 : vector<8x1xf32>
    %cst_20 = arith.constant 1.600000e+01 : f32
    %45 = vector.broadcast %cst_20 : f32 to vector<8x1xf32>
    %46 = arith.mulf %44, %45 : vector<8x1xf32>
    %cst_21 = arith.constant 1.000000e+00 : f32
    %47 = vector.broadcast %cst_21 : f32 to vector<8x1xf32>
    %48 = arith.subf %46, %47 : vector<8x1xf32>
    %cst_22 = arith.constant 5.000000e-01 : f32
    %49 = vector.broadcast %cst_22 : f32 to vector<8x1xf32>
    %50 = arith.mulf %48, %49 : vector<8x1xf32>
    %cst_23 = arith.constant 0.000000e+00 : f32
    %51 = vector.broadcast %cst_23 : f32 to vector<8x4xf32>
    %52 = tpu.iota {dimensions = array<i32: 1>} : vector<1x256xi32>
    %c0_i32 = arith.constant 0 : i32
    %53 = vector.broadcast %c0_i32 : i32 to vector<1x256xi32>
    %54 = arith.addi %52, %53 : vector<1x256xi32>
    %55 = arith.sitofp %54 : vector<1x256xi32> to vector<1x256xf32>
    %cst_24 = arith.constant 1.600000e+01 : f32
    %56 = vector.broadcast %cst_24 : f32 to vector<1x256xf32>
    %57 = arith.divf %55, %56 : vector<1x256xf32>
    %58 = math.floor %57 : vector<1x256xf32>
    %cst_25 = arith.constant 1.600000e+01 : f32
    %59 = vector.broadcast %cst_25 : f32 to vector<1x256xf32>
    %60 = arith.mulf %58, %59 : vector<1x256xf32>
    %61 = arith.subf %55, %60 : vector<1x256xf32>
    %62 = vector.broadcast %50 : vector<8x1xf32> to vector<8x256xf32>
    %63 = vector.broadcast %58 : vector<1x256xf32> to vector<8x256xf32>
    %64 = arith.subf %62, %63 : vector<8x256xf32>
    %65 = math.absf %64 : vector<8x256xf32>
    %cst_26 = arith.constant 1.000000e+00 : f32
    %66 = vector.broadcast %cst_26 : f32 to vector<8x256xf32>
    %67 = arith.subf %66, %65 : vector<8x256xf32>
    %cst_27 = arith.constant 0.000000e+00 : f32
    %68 = vector.broadcast %cst_27 : f32 to vector<8x256xf32>
    %69 = arith.maximumf %68, %67 : vector<8x256xf32>
    %70 = vector.broadcast %42 : vector<8x1xf32> to vector<8x256xf32>
    %71 = vector.broadcast %61 : vector<1x256xf32> to vector<8x256xf32>
    %72 = arith.subf %70, %71 : vector<8x256xf32>
    %73 = math.absf %72 : vector<8x256xf32>
    %cst_28 = arith.constant 1.000000e+00 : f32
    %74 = vector.broadcast %cst_28 : f32 to vector<8x256xf32>
    %75 = arith.subf %74, %73 : vector<8x256xf32>
    %cst_29 = arith.constant 0.000000e+00 : f32
    %76 = vector.broadcast %cst_29 : f32 to vector<8x256xf32>
    %77 = arith.maximumf %76, %75 : vector<8x256xf32>
    %78 = arith.mulf %69, %77 : vector<8x256xf32>
    %c0_30 = arith.constant 0 : index
    %c0_31 = arith.constant 0 : index
    %c0_32 = arith.constant 0 : index
    %79 = vector.load %arg3[%c0_30, %c0_31, %c0_32] : memref<1x256x4xf32, #tpu.memory_space<vmem>>, vector<1x256x4xf32>
    %80 = vector.shape_cast %79 : vector<1x256x4xf32> to vector<256x4xf32>
    %cst_33 = arith.constant dense<0.000000e+00> : vector<8x4xf32>
    %81 = tpu.matmul %78, %80, %cst_33 {dimension_numbers = #tpu.dot_dimension_numbers<[1], [0], [0], [1], [0, 0, 1, 1], [], []>, precision = #tpu.contract_precision<fp32>} : vector<8x256xf32>, vector<256x4xf32>, vector<8x4xf32> -> vector<8x4xf32>
    %82 = arith.addf %51, %81 : vector<8x4xf32>
    %cst_34 = arith.constant 1.000000e+00 : f32
    %83 = vector.broadcast %cst_34 : f32 to vector<8x1xf32>
    %84 = arith.addf %28, %83 : vector<8x1xf32>
    %cst_35 = arith.constant 8.000000e+00 : f32
    %85 = vector.broadcast %cst_35 : f32 to vector<8x1xf32>
    %86 = arith.mulf %84, %85 : vector<8x1xf32>
    %cst_36 = arith.constant 1.000000e+00 : f32
    %87 = vector.broadcast %cst_36 : f32 to vector<8x1xf32>
    %88 = arith.subf %86, %87 : vector<8x1xf32>
    %cst_37 = arith.constant 5.000000e-01 : f32
    %89 = vector.broadcast %cst_37 : f32 to vector<8x1xf32>
    %90 = arith.mulf %88, %89 : vector<8x1xf32>
    %cst_38 = arith.constant 1.000000e+00 : f32
    %91 = vector.broadcast %cst_38 : f32 to vector<8x1xf32>
    %92 = arith.addf %34, %91 : vector<8x1xf32>
    %cst_39 = arith.constant 8.000000e+00 : f32
    %93 = vector.broadcast %cst_39 : f32 to vector<8x1xf32>
    %94 = arith.mulf %92, %93 : vector<8x1xf32>
    %cst_40 = arith.constant 1.000000e+00 : f32
    %95 = vector.broadcast %cst_40 : f32 to vector<8x1xf32>
    %96 = arith.subf %94, %95 : vector<8x1xf32>
    %cst_41 = arith.constant 5.000000e-01 : f32
    %97 = vector.broadcast %cst_41 : f32 to vector<8x1xf32>
    %98 = arith.mulf %96, %97 : vector<8x1xf32>
    %cst_42 = arith.constant 0.000000e+00 : f32
    %99 = vector.broadcast %cst_42 : f32 to vector<8x8xf32>
    %100 = tpu.iota {dimensions = array<i32: 1>} : vector<1x64xi32>
    %c0_i32_43 = arith.constant 0 : i32
    %101 = vector.broadcast %c0_i32_43 : i32 to vector<1x64xi32>
    %102 = arith.addi %100, %101 : vector<1x64xi32>
    %103 = arith.sitofp %102 : vector<1x64xi32> to vector<1x64xf32>
    %cst_44 = arith.constant 8.000000e+00 : f32
    %104 = vector.broadcast %cst_44 : f32 to vector<1x64xf32>
    %105 = arith.divf %103, %104 : vector<1x64xf32>
    %106 = math.floor %105 : vector<1x64xf32>
    %cst_45 = arith.constant 8.000000e+00 : f32
    %107 = vector.broadcast %cst_45 : f32 to vector<1x64xf32>
    %108 = arith.mulf %106, %107 : vector<1x64xf32>
    %109 = arith.subf %103, %108 : vector<1x64xf32>
    %110 = vector.broadcast %98 : vector<8x1xf32> to vector<8x64xf32>
    %111 = vector.broadcast %106 : vector<1x64xf32> to vector<8x64xf32>
    %112 = arith.subf %110, %111 : vector<8x64xf32>
    %113 = math.absf %112 : vector<8x64xf32>
    %cst_46 = arith.constant 1.000000e+00 : f32
    %114 = vector.broadcast %cst_46 : f32 to vector<8x64xf32>
    %115 = arith.subf %114, %113 : vector<8x64xf32>
    %cst_47 = arith.constant 0.000000e+00 : f32
    %116 = vector.broadcast %cst_47 : f32 to vector<8x64xf32>
    %117 = arith.maximumf %116, %115 : vector<8x64xf32>
    %118 = vector.broadcast %90 : vector<8x1xf32> to vector<8x64xf32>
    %119 = vector.broadcast %109 : vector<1x64xf32> to vector<8x64xf32>
    %120 = arith.subf %118, %119 : vector<8x64xf32>
    %121 = math.absf %120 : vector<8x64xf32>
    %cst_48 = arith.constant 1.000000e+00 : f32
    %122 = vector.broadcast %cst_48 : f32 to vector<8x64xf32>
    %123 = arith.subf %122, %121 : vector<8x64xf32>
    %cst_49 = arith.constant 0.000000e+00 : f32
    %124 = vector.broadcast %cst_49 : f32 to vector<8x64xf32>
    %125 = arith.maximumf %124, %123 : vector<8x64xf32>
    %126 = arith.mulf %117, %125 : vector<8x64xf32>
    %c0_50 = arith.constant 0 : index
    %c0_51 = arith.constant 0 : index
    %c0_52 = arith.constant 0 : index
    %127 = vector.load %arg4[%c0_50, %c0_51, %c0_52] : memref<1x64x8xf32, #tpu.memory_space<vmem>>, vector<1x64x8xf32>
    %128 = vector.shape_cast %127 : vector<1x64x8xf32> to vector<64x8xf32>
    %cst_53 = arith.constant dense<0.000000e+00> : vector<8x8xf32>
    %129 = tpu.matmul %126, %128, %cst_53 {dimension_numbers = #tpu.dot_dimension_numbers<[1], [0], [0], [1], [0, 0, 1, 1], [], []>, precision = #tpu.contract_precision<fp32>} : vector<8x64xf32>, vector<64x8xf32>, vector<8x8xf32> -> vector<8x8xf32>
    %130 = arith.addf %99, %129 : vector<8x8xf32>
    %cst_54 = arith.constant 0.000000e+00 : f32
    %131 = vector.broadcast %cst_54 : f32 to vector<8x113xf32>
    %132 = tpu.concatenate %1, %82, %130, %131 in 1 : vector<8x3xf32>, vector<8x4xf32>, vector<8x8xf32>, vector<8x113xf32> -> vector<8x128xf32>
    %c0_55 = arith.constant 0 : index
    %c0_56 = arith.constant 0 : index
    %c0_57 = arith.constant 0 : index
    %133 = vector.load %arg5[%c0_55, %c0_56, %c0_57] : memref<1x8x128xf32, #tpu.memory_space<vmem>>, vector<1x8x128xf32>
    %134 = vector.shape_cast %133 : vector<1x8x128xf32> to vector<8x128xf32>
    %135 = vector.shape_cast %132 : vector<8x128xf32> to vector<1x8x128xf32>
    tpu.vector_store %arg5[%c0_55, %c0_56, %c0_57], %135 {strides = array<i32>} : memref<1x8x128xf32, #tpu.memory_space<vmem>>, vector<1x8x128xf32>,
    return
  }
  func.func @transform_0(%arg0: i32, %arg1: i32) -> (i32, i32, i32) {
    %c0_i32 = arith.constant 0 : i32
    %c0_i32_0 = arith.constant 0 : i32
    return %arg0, %arg1, %c0_i32 : i32, i32, i32
  }
  func.func @transform_1(%arg0: i32, %arg1: i32) -> (i32, i32, i32) {
    %c0_i32 = arith.constant 0 : i32
    %c0_i32_0 = arith.constant 0 : i32
    %c0_i32_1 = arith.constant 0 : i32
    return %arg0, %c0_i32, %c0_i32_0 : i32, i32, i32
  }
  func.func @transform_2(%arg0: i32, %arg1: i32) -> (i32, i32, i32) {
    %c0_i32 = arith.constant 0 : i32
    %c0_i32_0 = arith.constant 0 : i32
    %c0_i32_1 = arith.constant 0 : i32
    return %arg0, %c0_i32, %c0_i32_0 : i32, i32, i32
  }
  func.func @transform_3(%arg0: i32, %arg1: i32) -> (i32, i32, i32) {
    %c0_i32 = arith.constant 0 : i32
    %c0_i32_0 = arith.constant 0 : i32
    return %arg0, %arg1, %c0_i32 : i32, i32, i32
  }
}

</mosaic_0001>

<bundles_post_ra>
// kernel: tpu_custom_call.1
= control target key start
LH: loop header
LB: loop body
LE: loop exit
PB: predicated region body
PF: predicated region fallthrough
CT: control target
= control target key end

     0   :  { %8 = vsyncpa [#allocation3], 0  ;;  %s3499_s0 = inlined_call_operand.vmem [shape: f32[2,8,3], index: 0, kind: input, shape index: {}]   ;;  %s3500_s1 = inlined_call_operand.vmem [shape: f32[2,256,4], index: 1, kind: input, shape index: {}]   ;;  %s3501_s2 = inlined_call_operand.vmem [shape: f32[2,64,8], index: 2, kind: input, shape index: {}]   ;;  %s3502_s3 = inlined_call_operand.hbm [shape: f32[2,8,128], index: 3, kind: output, shape index: {}]  }
   0x1   :  { %10 = vsyncpa [#allocation3 + $0x1], 0  ;;  %s2758_s12 = smov 0   ;;  %s2760_s13 = smov 0  }
   0x2   :  { %s2762_s14 = smov 0   ;;  %s2764_s15 = smov 0  }
   0x3   :  { %s2766_s16 = smov 0   ;;  %s2768_s17 = smov 0  }
   0x4 LB: > { %s1903_s18 = sadd.s32 4294967295, %s2726_s17   ;;  %s1904_s19 = sadd.s32 4294967294, %s2726_s17   ;;  %s2726_s17 = sphi %s2768_s17, %s16_s17   ;;  %s2722_s16 = sphi %s2766_s16, %s3541_s16   ;;  %s2718_s15 = sphi %s2764_s15, %s3540_s15   ;;  %s2714_s14 = sphi %s2762_s14, %s3539_s14   ;;  %s2710_s13 = sphi %s2760_s13, %s3538_s13   ;;  %s2706_s12 = sphi %s2758_s12, %s3537_s12  }
   0x5   : > { %s28_s20 = sadd.s32 1, %s2722_s16  ;;  %s117_s21 = sadd.s32 1, %s2714_s14 }
   0x6   : > { %p30_p0 = scmp.ge.s32.totalorder %s28_s20, 2  ;;  %p127_p1 = scmp.ne.s32.totalorder %s2714_s14, %s2710_s13 }
   0x7   : > { %p128_p2 = scmp.eq.s32.totalorder %s1903_s18, 1  ;;  %p133_p3 = scmp.ne.s32.totalorder %s2710_s13, %s2706_s12 }
   0x8   : > { %s3543_s20 = smov (%p30_p0, %s28_s20), 0  ;;  %p134_p5 = scmp.eq.s32.totalorder %s1904_s19, 1 }
   0x9   : > { %p2798_p4 = por %p128_p2, %p127_p1  ;;  %s112_s23 = ssub.s32 %s2722_s16, %s3543_s20 }
   0xa   : > { %p1907_p6 = scmp.ge.s32.totalorder %s2726_s17, 1  ;;  %p115_p7 = scmp.eq.s32.totalorder %s112_s23, 0 }
   0xb   : > { %p2805_p8 = por %p134_p5, %p133_p3  ;;  %p178_p9 = scmp.lt.s32.totalorder %s2726_s17, 3 }
   0xc   : > { %s2811_s25 = scalar_select %p115_p7, %s2714_s14, %s117_s21  }
   0xd   : > { %p179_p10 = pnand %p1907_p6, %p178_p9 }
   0xf   : > { %182 = sbr.rel (%p179_p10) target bundleno = 788 (0x314), region = 32 }
  0x16   : > { %p214_p11 = scmp.lt.s32.totalorder %s2718_s15, 1  ;;  %s2728_s4 = smov 126   ;;  %v2729_v3 = vmov 1   ;;  %vm2733_vm0 = vmmov 0   ;;  %vm1237_vm1 = vcmask 523264   ;;  %vm1786_vm2 = vcmask 23552  }
  0x17   : > { %2643 = vset.pattern.permute.xlu0 %v2729_v3  ;;  %2641 = vset.pattern.permute.xlu1 %v2729_v3  ;;  %s2730_s5 = smov 127   ;;  %s2735_s21 = smov 3   ;;  %vm1788_vm3 = vcmask 56320   ;;  %vm1790_vm4 = vcmask 121856  }
  0x18   : > { %s2815_s26 = scalar_select %p214_p11, %s2718_s15, 1 }
  0x19   : > { %s2736_s23 = smov 7   ;;  %s1921_s28 = sshll.u32 %s2718_s15, 7 }
  0x1a   : > { %s1909_s27 = sshll.u32 %s2815_s26, 3  ;;  %s1924_s6 = sshll.u32 %s2815_s26, 8 }
  0x1b   : > { %s2821_s30 = scalar_lea.vmem %s3499_s0, %s1909_s27  ;;  %s2831_s9 = scalar_lea.vmem %s3500_s1, %s1924_s6 }
  0x1c   : > { %v2824_v0 = vld [vmem:[%s2821_s30] sm:$0xff]  ;;  %v322_v5 = vld [vmem:[%s2831_s9 + $0x88] sm:$0xff]  ;;  %v323_v11 = vld [vmem:[%s2831_s9 + $0x90] sm:$0xff]  ;;  %s1925_s10 = sshll.u32 %s2815_s26, 6  ;;  %s211_s26 = sand.u32 1, %s2710_s13  }
  0x1d   : > { %v233_v1 = vadd.f32 -0.8, %v2824_v0  ;;  %v321_v4 = vld [vmem:[%s2831_s9 + $0x80] sm:$0xff]  ;;  %v389_v8 = vand.u32 4294901760, %v322_v5  ;;  %v306_v9 = vld [vmem:[%s2831_s9 + $0x8] sm:$0xff]  ;;  %v324_v12 = vld [vmem:[%s2831_s9 + $0x98] sm:$0xff]  ;;  %s3179_s19 = scalar_lea.vmem %s3501_s2, %s1925_s10  ;;  %s3452_s7 = scalar_lea.hbm %s3502_s3, %s1921_s28 }
  0x1e   : > { %v305_v6 = vld [vmem:[%s2831_s9] sm:$0xff]  ;;  %v386_v7 = vand.u32 4294901760, %v321_v4  ;;  %v341_v13 = vand.u32 4294901760, %v306_v9  ;;  %v392_v14 = vand.u32 4294901760, %v323_v11  ;;  %v395_v15 = vand.u32 4294901760, %v324_v12  ;;  %v307_v16 = vld [vmem:[%s2831_s9 + $0x10] sm:$0xff] }
  0x1f   : > { %2645 = vrcp.f32 %v233_v1  ;;  %v338_v10 = vand.u32 4294901760, %v305_v6  ;;  %v308_v17 = vld [vmem:[%s2831_s9 + $0x18] sm:$0xff]  ;;  %v2843_v19 = vsub.f32 %v322_v5, %v389_v8  ;;  %v344_v21 = vand.u32 4294901760, %v307_v16  ;;  %v2848_v22 = vld [vmem:[%s2831_s9 + $0xa0] sm:$0xff]  ;;  %v2857_v27 = vld [vmem:[%s2831_s9 + $0xa8] sm:$0xff]  ;;  %s1908_s27 = sshll.u32 %s211_s26, 3 }
  0x20   : > { %v2841_v18 = vsub.f32 %v321_v4, %v386_v7  ;;  %v2850_v23 = vsub.f32 %v306_v9, %v341_v13  ;;  %v2852_v24 = vsub.f32 %v323_v11, %v392_v14  ;;  %v2854_v25 = vsub.f32 %v324_v12, %v395_v15  ;;  %v2860_v28 = vld [vmem:[%s2831_s9 + $0x20] sm:$0xff]  ;;  %v2863_v29 = vld [vmem:[%s2831_s9 + $0x28] sm:$0xff]  ;;  %v2874_v34 = vld [vmem:[%s2831_s9 + $0xb0] sm:$0xff]  ;;  %s213_s29 = scalar_lea.vmem [#allocation2], %s1908_s27  ;;  %s1794_s15 = scalar_lea.sflag [#allocation3], %s211_s26 }
  0x21   : > { %v2845_v20 = vsub.f32 %v305_v6, %v338_v10  ;;  %v347_v26 = vand.u32 4294901760, %v308_v17  ;;  %v2867_v31 = vsub.f32 %v307_v16, %v344_v21  ;;  %v2869_v32 = vpack.c.bf16 %v389_v8, %v386_v7  ;;  %v2884_v39 = vld [vmem:[%s2831_s9 + $0xb8] sm:$0xff]  ;;  %v311_v6 = vld [vmem:[%s2831_s9 + $0x30] sm:$0xff] }
  0x22   : > { %v2368_v30 = vpack.c.bf16 %v2843_v19, %v2841_v18  ;;  %v2871_v33 = vpack.c.bf16 %v341_v13, %v338_v10  ;;  %v2372_v36 = vpack.c.bf16 %v2854_v25, %v2852_v24  ;;  %v398_v38 = vand.u32 4294901760, %v2848_v22  ;;  %v312_v7 = vld [vmem:[%s2831_s9 + $0x38] sm:$0xff] }
  0x23   : > { %v2370_v35 = vpack.c.bf16 %v2850_v23, %v2845_v20  ;;  %v2880_v37 = vsub.f32 %v308_v17, %v347_v26  ;;  %2305 = vmatprep.subr.bf16.mxu1 %v2869_v32  ;;  %v401_v40 = vand.u32 4294901760, %v2857_v27  ;;  %v350_v41 = vand.u32 4294901760, %v2860_v28 }
  0x24   : > { %2369 = vmatprep.subr.bf16.mxu0 %v2368_v30  ;;  %v353_v42 = vand.u32 4294901760, %v2863_v29  ;;  %v2890_v43 = vpack.c.bf16 %v395_v15, %v392_v14  ;;  %2307 = vmatpush3.bf16.msra.mxu1 %v2871_v33  ;;  %v2898_v45 = vsub.f32 %v2848_v22, %v398_v38  ;;  %v2900_v46 = vpack.c.bf16 %v347_v26, %v344_v21  ;;  %v330_v15 = vld [vmem:[%s2831_s9 + $0xc8] sm:$0xff]  ;;  %v2944_v26 = vld [vmem:[%s2831_s9 + $0x40] sm:$0xff] }
  0x25   : > { %2371 = vmatpush3.bf16.msra.mxu0 %v2370_v35  ;;  %v2374_v44 = vpack.c.bf16 %v2880_v37, %v2867_v31  ;;  %v404_v47 = vand.u32 4294901760, %v2874_v34  ;;  %v2904_v48 = vsub.f32 %v2857_v27, %v401_v40  ;;  %v2909_v49 = vsub.f32 %v2860_v28, %v350_v41  ;;  %v314_v27 = vld [vmem:[%s2831_s9 + $0x48] sm:$0xff]  ;;  %v316_v28 = vld [vmem:[%s2831_s9 + $0x58] sm:$0xff] }
  0x26   : > { %2373 = vmatprep.subr.bf16.mxu0 %v2372_v36  ;;  %v2912_v50 = vsub.f32 %v2863_v29, %v353_v42  ;;  %2309 = vmatprep.subr.bf16.mxu1 %v2890_v43  ;;  %v407_v51 = vand.u32 4294901760, %v2884_v39  ;;  %v356_v11 = vand.u32 4294901760, %v311_v6  ;;  %v359_v12 = vand.u32 4294901760, %v312_v7 }
  0x27   : > { %v2919_v52 = vsub.f32 %v2874_v34, %v404_v47  ;;  %v2376_v53 = vpack.c.bf16 %v2904_v48, %v2898_v45  ;;  %v413_v36 = vand.u32 4294901760, %v330_v15  ;;  %v371_v34 = vand.u32 4294901760, %v316_v28 }
  0x28   : > { %v2926_v54 = vsub.f32 %v2884_v39, %v407_v51  ;;  %v2378_v55 = vpack.c.bf16 %v2912_v50, %v2909_v49  ;;  %2311 = vmatpush3.bf16.msra.mxu1 %v2900_v46  ;;  %v2939_v16 = vsub.f32 %v311_v6, %v356_v11  ;;  %v2941_v17 = vsub.f32 %v312_v7, %v359_v12  ;;  %v333_v39 = vld [vmem:[%s2831_s9 + $0xe0] sm:$0xff] }
  0x29   : > { %v2646_v2 = vpop.eup %2645  ;;  %2375 = vmatpush3.bf16.msra.mxu0 %v2374_v44  ;;  %v2731_v6 = vmov 0  }
  0x2a   : > { %237 = vrot.lane.b32.xlu0 %v2646_v2, %s2728_s4  ;;  %2377 = vmatprep.subr.bf16.mxu0 %v2376_v53  ;;  %v2380_v56 = vpack.c.bf16 %v2926_v54, %v2919_v52  ;;  %v2382_v53 = vpack.c.bf16 %v2941_v17, %v2939_v16  ;;  %s1808_s4 = sshll.u32 %s213_s29, 4  ;;  %s3454_s4 = int_to_ptr.vmem [resolvable:$true] %s1808_s4 }
  0x2b   : > { %s2648_s8 = scalar_lea.vmem %s3454_s4, 128 }
  0x2c   : > { %p2649_p12 = scmp.ne.s32.totalorder %s3454_s4, %s2648_s8 }
  0x2d   : > { %2379 = vmatpush3.bf16.msra.mxu0 %v2378_v55  ;;  %v2951_v55 = vpack.c.bf16 %v401_v40, %v398_v38  ;;  %v315_v40 = vld [vmem:[%s2831_s9 + $0x50] sm:$0xff] }
  0x2e   : > { %243 = vrot.lane.b32.xlu0 %v2646_v2, %s2730_s5  ;;  %2381 = vmatprep.subr.bf16.mxu0 %v2380_v56  ;;  %p2650_p13 = pnand %p2649_p12, %p2798_p4 }
  0x2f   : > { %2313 = vmatprep.subr.bf16.mxu1 %v2951_v55 }
  0x30   : > { %p2651_p0 = pneg %p2650_p13 }
  0x31   : > { %2383 = vmatpush3.bf16.msra.mxu0 %v2382_v53 }
  0x9c   : > { %v238_v57 = vpop.permute.xlu0 %237 }
  0x9d   : > { %v240_v58 = vmul.f32 %v238_v57, %v2824_v0  ;;  %v2957_v57 = vpack.c.bf16 %v353_v42, %v350_v41 }
  0x9f   : > { %v241_v59 = vmul.f32 -248.0, %v240_v58  ;;  %v2959_v58 = vsub.f32 %v330_v15, %v413_v36  ;;  %2315 = vmatpush3.bf16.msra.mxu1 %v2957_v57 }
  0xa0   : > { %v244_v60 = vpop.permute.xlu0 %243 }
  0xa1   : > { %v249_v61 = vmul.f32 0.00896861, %v241_v59  ;;  %v246_v62 = vmul.f32 %v244_v60, %v2824_v0  ;;  %v329_v0 = vld [vmem:[%s2831_s9 + $0xc0] sm:$0xff]  ;;  %v362_v59 = vand.u32 4294901760, %v2944_v26  ;;  %v365_v60 = vand.u32 4294901760, %v314_v27 }
  0xa2   : > { %v410_v21 = vand.u32 4294901760, %v329_v0 }
  0xa3   : > { %v247_v63 = vmul.f32 248.0, %v246_v62  ;;  %v1914_v1 = vclamps-f32 %v249_v61, 1.0  ;;  %v2963_v61 = vld [vmem:[%s2831_s9 + $0xd0] sm:$0xff]  ;;  %v2966_v62 = vld [vmem:[%s2831_s9 + $0xd8] sm:$0xff]  ;;  %v2977_v42 = vsub.f32 %v2944_v26, %v362_v59  ;;  %v3017_v53 = vpack.c.bf16 %v365_v60, %v362_v59 }
  0xa4   : > { %v2953_v56 = vsub.f32 %v329_v0, %v410_v21  ;;  %v416_v22 = vand.u32 4294901760, %v2963_v61  ;;  %v419_v38 = vand.u32 4294901760, %v2966_v62  ;;  %v318_v0 = vld [vmem:[%s2831_s9 + $0x68] sm:$0xff] }
  0xa5   : > { %v252_v2 = vmul.f32 0.00896861, %v247_v63  ;;  %v255_v4 = vadd.f32 1.0, %v1914_v1  ;;  %v2979_v63 = vsub.f32 %v314_v27, %v365_v60  ;;  %v368_v1 = vand.u32 4294901760, %v315_v40  ;;  %3521 = vst [vmem:[#allocation5_spill] sm:$0xff] %v3017_v53 }
  0xa6   : > { %v2384_v41 = vpack.c.bf16 %v2959_v58, %v2953_v56  ;;  %v377_v26 = vand.u32 4294901760, %v318_v0 }
  0xa7   : > { %v1915_v3 = vclamps-f32 %v252_v2, 1.0  ;;  %v256_v10 = vmul.f32 16.0, %v255_v4  ;;  %v1199_v29 = vmul.f32 8.0, %v255_v4  ;;  %v2985_v4 = vpack.c.bf16 %v407_v51, %v404_v47  ;;  %v334_v47 = vld [vmem:[%s2831_s9 + $0xe8] sm:$0xff] }
  0xa8   : > { %2385 = vmatprep.subr.bf16.mxu0 %v2384_v41  ;;  %v2386_v7 = vpack.c.bf16 %v2979_v63, %v2977_v42  ;;  %v3000_v51 = vsub.f32 %v315_v40, %v368_v1  ;;  %v335_v40 = vld [vmem:[%s2831_s9 + $0xf0] sm:$0xff] }
  0xa9   : > { %v259_v5 = vadd.f32 1.0, %v1915_v3  ;;  %v1916_v44 = vadd.f32 -1.0, %v256_v10  ;;  %v1918_v3 = vadd.f32 -1.0, %v1199_v29  ;;  %2317 = vmatprep.subr.bf16.mxu1 %v2985_v4  ;;  %v422_v10 = vand.u32 4294901760, %v333_v39 }
  0xaa   : > { %2387 = vmatpush3.bf16.msra.mxu0 %v2386_v7  ;;  %v3009_v29 = vpack.c.bf16 %v413_v36, %v410_v21  ;;  %v336_v21 = vld [vmem:[%s2831_s9 + $0xf8] sm:$0xff]  ;;  %v3033_v7 = vpack.c.bf16 %v419_v38, %v416_v22 }
  0xab   : > { %v1202_v8 = vmul.f32 8.0, %v259_v5  ;;  %v260_v9 = vmul.f32 16.0, %v259_v5  ;;  %v258_v2 = vmul.f32 0.5, %v1916_v44  ;;  %v2988_v5 = vsub.f32 %v2963_v61, %v416_v22 }
  0xac   : > { %v1201_v27 = vmul.f32 0.5, %v1918_v3  ;;  %v431_v41 = vand.u32 4294901760, %v336_v21  ;;  %v320_v3 = vld [vmem:[%s2831_s9 + $0x78] sm:$0xff]  ;;  %3522 = vst [vmem:[#allocation6_spill] sm:$0xff] %v3033_v7 }
  0xad   : > { %v1919_v13 = vadd.f32 -1.0, %v1202_v8  ;;  %v1917_v14 = vadd.f32 -1.0, %v260_v9  ;;  %v2992_v8 = vpack.c.bf16 %v359_v12, %v356_v11  ;;  %v2995_v9 = vsub.f32 %v2966_v62, %v419_v38 }
  0xae   : > { %v3007_v12 = vsub.f32 %v316_v28, %v371_v34  ;;  %v3021_v62 = vsub.f32 %v318_v0, %v377_v26  ;;  %v428_v28 = vand.u32 4294901760, %v335_v40 }
  0xaf   : > { %v1204_v30 = vmul.f32 0.5, %v1919_v13  ;;  %v262_v35 = vmul.f32 0.5, %v1917_v14  ;;  %v425_v13 = vand.u32 4294901760, %v334_v47  ;;  %v317_v14 = vld [vmem:[%s2831_s9 + $0x60] sm:$0xff]  ;;  %2319 = vmatpush3.bf16.msra.mxu1 %v2992_v8  ;;  %v2388_v11 = vpack.c.bf16 %v2995_v9, %v2988_v5 }
  0xb0   : > { %v374_v15 = vand.u32 4294901760, %v317_v14  ;;  %v2390_v44 = vpack.c.bf16 %v3007_v12, %v3000_v51  ;;  %2321 = vmatprep.subr.bf16.mxu1 %v3009_v29 }
  0xb1   : > { %1212 = vperm.xlu0 %2643, %v1204_v30   ;;  %279 = vperm.xlu1 %2641, %v262_v35   ;;  %v3011_v30 = vsub.f32 %v333_v39, %v422_v10  ;;  %v3013_v35 = vsub.f32 %v334_v47, %v425_v13  ;;  %v3035_v39 = vsub.f32 %v335_v40, %v428_v28 }
  0xb2   : > { %2389 = vmatprep.subr.bf16.mxu0 %v2388_v11  ;;  %v3019_v61 = vsub.f32 %v317_v14, %v374_v15  ;;  %v3037_v47 = vsub.f32 %v336_v21, %v431_v41  ;;  %v3039_v14 = vpack.c.bf16 %v371_v34, %v368_v1  ;;  %v3051_v38 = vpack.c.bf16 %v425_v13, %v422_v10 }
  0xb3   : > { %v2392_v36 = vpack.c.bf16 %v3013_v35, %v3011_v30  ;;  %2391 = vmatpush3.bf16.msra.mxu0 %v2390_v44  ;;  %2323 = vmatpush3.bf16.msra.mxu1 %v3017_v53  ;;  %v564_v1 = vand.u32 4294901760, %v2841_v18  ;;  %v571_v34 = vand.u32 4294901760, %v2843_v19  ;;  %v3055_v44 = vpack.c.bf16 %v377_v26, %v374_v15 }
  0xb4   : > { %v2394_v59 = vpack.c.bf16 %v3021_v62, %v3019_v61  ;;  %3523 = vst [vmem:[#allocation7_spill] sm:$0xff] %v3039_v14  ;;  %2325 = vmatprep.subr.bf16.mxu1 %v3033_v7  ;;  %3524 = vst [vmem:[#allocation8_spill] sm:$0xff] %v3051_v38  ;;  %v3059_v21 = vpack.c.bf16 %v431_v41, %v428_v28  ;;  %v627_v41 = vand.u32 4294901760, %v2959_v58  ;;  %v662_v7 = vand.u32 4294901760, %v3035_v39 }
  0xb5   : > { %2642 = vset.pattern.permute.xlu1 %v2731_v6  ;;  %2644 = vset.pattern.permute.xlu0 %v2731_v6  ;;  %v383_v6 = vand.u32 4294901760, %v320_v3  ;;  %3525 = vst [vmem:[#allocation9_spill] sm:$0xff] %v3055_v44  ;;  %v2432_v40 = vpack.c.bf16 %v571_v34, %v564_v1  ;;  %v572_v10 = vsub.f32 %v2843_v19, %v571_v34  ;;  %v508_v19 = vand.u32 4294901760, %v2977_v42 }
  0xb6   : > { %292 = vperm.xlu1 %2642, %v258_v2   ;;  %v319_v2 = vld [vmem:[%s2831_s9 + $0x70] sm:$0xff]  ;;  %2393 = vmatprep.subr.bf16.mxu0 %v2392_v36  ;;  %3526 = vst [vmem:[#allocation10_spill] sm:$0xff] %v3059_v21  ;;  %v565_v36 = vsub.f32 %v2841_v18, %v564_v1  ;;  %v620_v18 = vand.u32 4294901760, %v2953_v56 }
  0xb7   : > { %v380_v60 = vand.u32 4294901760, %v319_v2  ;;  %v3043_v11 = vsub.f32 %v320_v3, %v383_v6  ;;  %2395 = vmatpush3.bf16.msra.mxu0 %v2394_v59  ;;  %2327 = vmatpush3.bf16.msra.mxu1 %v3039_v14  ;;  %v573_v15 = vand.u32 4294901760, %v572_v10  ;;  %v494_v3 = vand.u32 4294901760, %v2939_v16 }
  0xb8   : > { %2329 = vmatprep.subr.bf16.mxu1 %v3051_v38  ;;  %v566_v13 = vand.u32 4294901760, %v565_v36  ;;  %v501_v59 = vand.u32 4294901760, %v2941_v17  ;;  %v641_v36 = vand.u32 4294901760, %v2995_v9  ;;  %v648_v38 = vand.u32 4294901760, %v3011_v30 }
  0xb9   : > { %v3041_v0 = vsub.f32 %v319_v2, %v380_v60  ;;  %v3062_v2 = vpack.c.bf16 %v383_v6, %v380_v60  ;;  %v515_v60 = vand.u32 4294901760, %v2979_v63  ;;  %v3075_v6 = vpack.c.bf16 %v627_v41, %v620_v18 }
  0xba   : > { %1221 = vperm.xlu1 %2642, %v1201_v27   ;;  %v2396_v27 = vpack.c.bf16 %v3037_v47, %v3035_v39  ;;  %v2336_v26 = vpack.c.bf16 %v573_v15, %v566_v13  ;;  %v3069_v28 = vpack.c.bf16 %v501_v59, %v494_v3  ;;  %v502_v1 = vsub.f32 %v2941_v17, %v501_v59 }
  0xbb   : > { %v2398_v22 = vpack.c.bf16 %v3043_v11, %v3041_v0  ;;  %2331 = vmatpush3.bf16.msra.mxu1 %v3055_v44  ;;  %3527 = vst [vmem:[#allocation11_spill] sm:$0xff] %v3062_v2  ;;  %v522_v13 = vand.u32 4294901760, %v3000_v51  ;;  %v529_v15 = vand.u32 4294901760, %v3007_v12  ;;  %v655_v14 = vand.u32 4294901760, %v3013_v35 }
  0xbc   : > { %2397 = vmatprep.subr.bf16.mxu0 %v2396_v27  ;;  %2333 = vmatprep.subr.bf16.mxu1 %v3059_v21  ;;  %v495_v27 = vsub.f32 %v2939_v16, %v494_v3  ;;  %v503_v10 = vand.u32 4294901760, %v502_v1  ;;  %v628_v16 = vsub.f32 %v2959_v58, %v627_v41  ;;  %v509_v3 = vsub.f32 %v2977_v42, %v508_v19 }
  0xbd   : > { %2399 = vmatpush3.bf16.msra.mxu0 %v2398_v22  ;;  %v3078_v22 = vpack.c.bf16 %v515_v60, %v508_v19  ;;  %v3092_v17 = vpack.c.bf16 %v529_v15, %v522_v13  ;;  %v543_v58 = vand.u32 4294901760, %v3021_v62  ;;  %v3102_v19 = vpack.c.bf16 %v655_v14, %v648_v38 }
  0xbe   : > { %2433 = vmatprep.subr.bf16.mxu0 %v2432_v40  ;;  %v496_v34 = vand.u32 4294901760, %v495_v27  ;;  %v634_v40 = vand.u32 4294901760, %v2988_v5  ;;  %v516_v27 = vsub.f32 %v2979_v63, %v515_v60  ;;  %v629_v1 = vand.u32 4294901760, %v628_v16 }
  0xbf   : > { %2335 = vmatpush3.bf16.msra.mxu1 %v3062_v2  ;;  %v510_v44 = vand.u32 4294901760, %v509_v3  ;;  %v523_v63 = vsub.f32 %v3000_v51, %v522_v13  ;;  %v530_v16 = vsub.f32 %v3007_v12, %v529_v15  ;;  %v649_v51 = vsub.f32 %v3011_v30, %v648_v38 }
  0xc0   : > { %2337 = vmatprep.subr.bf16.mxu1 %v2336_v26  ;;  %v621_v26 = vsub.f32 %v2953_v56, %v620_v18  ;;  %v3086_v2 = vpack.c.bf16 %v641_v36, %v634_v40  ;;  %v3090_v21 = vpack.c.bf16 %v503_v10, %v496_v34  ;;  %v517_v56 = vand.u32 4294901760, %v516_v27 }
  0xc1   : > { %v536_v18 = vand.u32 4294901760, %v3019_v61  ;;  %v635_v42 = vsub.f32 %v2988_v5, %v634_v40  ;;  %v642_v34 = vsub.f32 %v2995_v9, %v641_v36  ;;  %v524_v27 = vand.u32 4294901760, %v523_v63 }
  0xc2   : > { %v622_v59 = vand.u32 4294901760, %v621_v26  ;;  %v3106_v60 = vpack.c.bf16 %v517_v56, %v510_v44  ;;  %v669_v5 = vand.u32 4294901760, %v3037_v47  ;;  %v531_v40 = vand.u32 4294901760, %v530_v16 }
  0xc3   : > { %v3108_v10 = vpack.c.bf16 %v543_v58, %v536_v18  ;;  %v636_v26 = vand.u32 4294901760, %v635_v42  ;;  %v643_v3 = vand.u32 4294901760, %v642_v34  ;;  %v557_v9 = vand.u32 4294901760, %v3043_v11 }
  0xc4   : > { %v3100_v41 = vpack.c.bf16 %v629_v1, %v622_v59  ;;  %v550_v59 = vand.u32 4294901760, %v3041_v0  ;;  %v3118_v36 = vpack.c.bf16 %v669_v5, %v662_v7  ;;  %v656_v13 = vsub.f32 %v3013_v35, %v655_v14 }
  0xc5   : > { %v3116_v44 = vpack.c.bf16 %v643_v3, %v636_v26  ;;  %v537_v12 = vsub.f32 %v3019_v61, %v536_v18  ;;  %v3122_v15 = vpack.c.bf16 %v531_v40, %v524_v27  ;;  %v650_v56 = vand.u32 4294901760, %v649_v51 }
  0xc6   : > { %v3124_v1 = vpack.c.bf16 %v557_v9, %v550_v59  ;;  %v544_v42 = vsub.f32 %v3021_v62, %v543_v58  ;;  %v657_v34 = vand.u32 4294901760, %v656_v13  ;;  %v663_v30 = vsub.f32 %v3035_v39, %v662_v7 }
  0xc7   : > { %v538_v63 = vand.u32 4294901760, %v537_v12  ;;  %v670_v38 = vsub.f32 %v3037_v47, %v669_v5  ;;  %v551_v26 = vsub.f32 %v3041_v0, %v550_v59  ;;  %v558_v35 = vsub.f32 %v3043_v11, %v557_v9 }
  0xc8   : > { %v545_v16 = vand.u32 4294901760, %v544_v42  ;;  %v3130_v3 = vpack.c.bf16 %v657_v34, %v650_v56  ;;  %v664_v14 = vand.u32 4294901760, %v663_v30  ;;  %v263_v51 = vlaneseq }
  0xc9   : > { %v671_v18 = vand.u32 4294901760, %v670_v38  ;;  %v552_v27 = vand.u32 4294901760, %v551_v26  ;;  %v559_v40 = vand.u32 4294901760, %v558_v35 }
  0xca   : > { %v3133_v61 = vpack.c.bf16 %v545_v16, %v538_v63  ;;  %v264_v7 = vand.u32 127, %v263_v51 }
  0xcb   : > { %v3135_v62 = vpack.c.bf16 %v671_v18, %v664_v14  ;;  %v3137_v58 = vpack.c.bf16 %v559_v40, %v552_v27 }
  0xcc   : > { %v265_v39 = vadd.s32 128, %v264_v7  ;;  %v3139_v47 = vcvt.s32.f32 %v264_v7 }
  0xce   : > { %v267_v0 = vcvt.s32.f32 %v265_v39  ;;  %v269_v5 = vmul.f32 0.0625, %v3139_v47 }
  0xd0   : > { %v270_v59 = vmul.f32 0.0625, %v267_v0  ;;  %v271_v11 = vfloor.f32 %v269_v5  ;;  %v452_v5 = vand.u32 4294901760, %v2845_v20 }
  0xd2   : > { %v272_v9 = vfloor.f32 %v270_v59  ;;  %v273_v13 = vmul.f32 16.0, %v271_v11  ;;  %v459_v59 = vand.u32 4294901760, %v2850_v23 }
  0xd4   : > { %v274_v12 = vmul.f32 16.0, %v272_v9  ;;  %v275_v63 = vsub.f32 %v3139_v47, %v273_v13 }
  0xd6   : > { %v276_v16 = vsub.f32 %v267_v0, %v274_v12  ;;  %v578_v0 = vand.u32 4294901760, %v2852_v24  ;;  %v585_v12 = vand.u32 4294901760, %v2854_v25 }
 0x130   : > { %v280_v56 = vpop.permute.xlu1 %279 }
 0x131   : > { %v282_v42 = vsub.f32 %v280_v56, %v271_v11  ;;  %v283_v34 = vsub.f32 %v280_v56, %v272_v9 }
 0x133   : > { %v284_v30 = vand.u32 2147483647, %v282_v42  ;;  %v285_v38 = vand.u32 2147483647, %v283_v34  ;;  %v453_v42 = vsub.f32 %v2845_v20, %v452_v5  ;;  %v460_v34 = vsub.f32 %v2850_v23, %v459_v59 }
 0x134   : > { %v592_v23 = vand.u32 4294901760, %v2898_v45 }
 0x135   : > { %v293_v26 = vpop.permute.xlu1 %292  ;;  %v286_v18 = vsub.f32 1.0, %v284_v30  ;;  %v287_v27 = vsub.f32 1.0, %v285_v38  ;;  %v579_v30 = vsub.f32 %v2852_v24, %v578_v0  ;;  %v586_v38 = vsub.f32 %v2854_v25, %v585_v12 }
 0x136   : > { %v295_v35 = vsub.f32 %v293_v26, %v275_v63  ;;  %v296_v14 = vsub.f32 %v293_v26, %v276_v16  ;;  %v461_v20 = vand.u32 4294901760, %v460_v34  ;;  %v599_v25 = vand.u32 4294901760, %v2904_v48 }
 0x137   : > { %v288_v11 = vmax.f32 %v286_v18, 0.0  ;;  %v289_v9 = vmax.f32 %v287_v27, 0.0  ;;  %v473_v18 = vand.u32 4294901760, %v2880_v37  ;;  %v2434_v27 = vpack.c.bf16 %v459_v59, %v452_v5 }
 0x138   : > { %v297_v40 = vand.u32 2147483647, %v295_v35  ;;  %v298_v51 = vand.u32 2147483647, %v296_v14  ;;  %v466_v14 = vand.u32 4294901760, %v2867_v31 }
 0x139   : > { %v474_v5 = vsub.f32 %v2880_v37, %v473_v18 }
 0x13a   : > { %v299_v7 = vsub.f32 1.0, %v297_v40  ;;  %v300_v39 = vsub.f32 1.0, %v298_v51  ;;  %v454_v40 = vand.u32 4294901760, %v453_v42  ;;  %v2438_v59 = vpack.c.bf16 %v473_v18, %v466_v14 }
 0x13b   : > { %v480_v42 = vand.u32 4294901760, %v2909_v49 }
 0x13c   : > { %v301_v56 = vmax.f32 %v299_v7, 0.0  ;;  %v302_v13 = vmax.f32 %v300_v39, 0.0  ;;  %v467_v7 = vsub.f32 %v2867_v31, %v466_v14  ;;  %v2436_v39 = vpack.c.bf16 %v585_v12, %v578_v0 }
 0x13d   : > { %v2338_v34 = vpack.c.bf16 %v461_v20, %v454_v40  ;;  %v487_v31 = vand.u32 4294901760, %v2912_v50  ;;  %v593_v0 = vsub.f32 %v2898_v45, %v592_v23  ;;  %v600_v12 = vsub.f32 %v2904_v48, %v599_v25 }
 0x13e   : > { %v303_v63 = vmul.f32 %v301_v56, %v288_v11  ;;  %v304_v16 = vmul.f32 %v302_v13, %v289_v9  ;;  %v580_v11 = vand.u32 4294901760, %v579_v30  ;;  %v587_v9 = vand.u32 4294901760, %v586_v38 }
 0x13f   : > { %v2440_v45 = vpack.c.bf16 %v599_v25, %v592_v23  ;;  %v475_v30 = vand.u32 4294901760, %v474_v5  ;;  %v606_v38 = vand.u32 4294901760, %v2919_v52  ;;  %v613_v14 = vand.u32 4294901760, %v2926_v54  ;;  %v3195_v25 = vld [vmem:[%s3179_s19] sm:$0xff] }
 0x140   : > { %v3151_v26 = vand.u32 4294901760, %v304_v16  ;;  %v3153_v35 = vand.u32 4294901760, %v303_v63  ;;  %v2340_v48 = vpack.c.bf16 %v587_v9, %v580_v11  ;;  %v481_v40 = vsub.f32 %v2909_v49, %v480_v42 }
 0x141   : > { %v488_v20 = vsub.f32 %v2912_v50, %v487_v31  ;;  %v601_v53 = vand.u32 4294901760, %v600_v12  ;;  %v614_v23 = vsub.f32 %v2926_v54, %v613_v14  ;;  %v2444_v11 = vpack.c.bf16 %v613_v14, %v606_v38 }
 0x142   : > { %v3159_v51 = vsub.f32 %v304_v16, %v3151_v26  ;;  %v3162_v24 = vsub.f32 %v303_v63, %v3153_v35  ;;  %v468_v16 = vand.u32 4294901760, %v467_v7  ;;  %v2442_v7 = vpack.c.bf16 %v487_v31, %v480_v42 }
 0x143   : > { %v482_v50 = vand.u32 4294901760, %v481_v40  ;;  %v1242_v54 = vand.u32 4294901760, %v3195_v25  ;;  %v1206_v31 = vmul.f32 0.125, %v3139_v47  ;;  %v3246_v40 = vld [vmem:[%s3179_s19 + $0x30] sm:$0xff] }
 0x144   : > { %811 = vmatprep.mubr.f32.mxu0 %v3159_v51  ;;  %v3515_v56 = vand.u32 4294901760, %v3159_v51  ;;  %v3518_v13 = vand.u32 4294901760, %v3162_v24  ;;  %v2342_v49 = vpack.c.bf16 %v475_v30, %v468_v16  ;;  %v3224_v16 = vld [vmem:[%s3179_s19 + $0x20] sm:$0xff] }
 0x145   : > { %814 = vmatmul.mubr.f32.vlgmr.msra.gmra.mrb[0].mxu0 %v3162_v24 }
 0x146   : > { %2435 = vmatpush3.bf16.msra.mxu0 %v2434_v27  ;;  %1088 = vmatprep.mubr.f32.mxu0 %v3151_v26  ;;  %v436_v37 = vsub.f32 %v3159_v51, %v3515_v56  ;;  %v442_v63 = vsub.f32 %v3162_v24, %v3518_v13  ;;  %v594_v56 = vand.u32 4294901760, %v593_v0  ;;  %v607_v13 = vsub.f32 %v2919_v52, %v606_v38  ;;  %v3208_v0 = vld [vmem:[%s3179_s19 + $0x18] sm:$0xff] }
 0x147   : > { %2437 = vmatprep.subr.bf16.mxu0 %v2436_v39  ;;  %v3198_v39 = vld [vmem:[%s3179_s19 + $0x8] sm:$0xff]  ;;  %v489_v52 = vand.u32 4294901760, %v488_v20  ;;  %v3250_v20 = vld [vmem:[%s3179_s19 + $0x38] sm:$0xff] }
 0x148   : > { %v437_v18 = vand.u32 4294901760, %v436_v37  ;;  %v443_v27 = vand.u32 4294901760, %v442_v63  ;;  %v2344_v9 = vpack.c.bf16 %v601_v53, %v594_v56  ;;  %v608_v5 = vand.u32 4294901760, %v607_v13 }
 0x149   : > { %v1245_v42 = vand.u32 4294901760, %v3198_v39  ;;  %v2346_v12 = vpack.c.bf16 %v489_v52, %v482_v50  ;;  %v3213_v53 = vsub.f32 %v3195_v25, %v1242_v54  ;;  %v1207_v37 = vfloor.f32 %v1206_v31  ;;  %v1213_v52 = vpop.permute.xlu0 %1212 }
 0x14a   : > { %2439 = vmatpush3.bf16.msra.mxu0 %v2438_v59  ;;  %438 = vmatprep.mubr.f32.mxu1 %v437_v18  ;;  %v615_v59 = vand.u32 4294901760, %v614_v23  ;;  %v1263_v50 = vand.u32 4294901760, %v3250_v20 }
 0x14b   : > { %444 = vmatmul.mubr.f32.vlgmr.msra.gmra.mrb[0].mxu1 %v443_v27  ;;  %2441 = vmatprep.subr.bf16.mxu0 %v2440_v45  ;;  %v3218_v13 = vsub.f32 %v3198_v39, %v1245_v42  ;;  %v1251_v45 = vand.u32 4294901760, %v3208_v0  ;;  %v1208_v30 = vmul.f32 8.0, %v1207_v37  ;;  %v1327_v38 = vand.u32 4294901760, %v3213_v53  ;;  %v3535_v39 = vld [vmem:[#allocation11_spill] sm:$0xff] }
 0x14c   : > { %2339 = vmatpush3.bf16.msra.mxu1 %v2338_v34  ;;  %674 = vmatprep.mubr.f32.mxu1 %v3151_v26  ;;  %v3205_v34 = vld [vmem:[%s3179_s19 + $0x10] sm:$0xff]  ;;  %v2348_v56 = vpack.c.bf16 %v615_v59, %v608_v5 }
 0x14d   : > { %2341 = vmatprep.subr.bf16.mxu1 %v2340_v48  ;;  %v1248_v63 = vand.u32 4294901760, %v3205_v34  ;;  %v3227_v48 = vld [vmem:[%s3179_s19 + $0x28] sm:$0xff]  ;;  %v1334_v14 = vand.u32 4294901760, %v3218_v13  ;;  %v1209_v23 = vsub.f32 %v3139_v47, %v1208_v30  ;;  %v1260_v47 = vand.u32 4294901760, %v3246_v40 }
 0x14e   : > { %2443 = vmatpush3.bf16.msra.mxu0 %v2442_v7  ;;  %v1257_v18 = vand.u32 4294901760, %v3227_v48  ;;  %v1222_v7 = vpop.permute.xlu1 %1221 }
 0x14f   : > { %2445 = vmatprep.subr.bf16.mxu0 %v2444_v11  ;;  %v3238_v27 = vsub.f32 %v3205_v34, %v1248_v63  ;;  %v1335_v11 = vsub.f32 %v3218_v13, %v1334_v14  ;;  %v2500_v25 = vpack.c.bf16 %v1251_v45, %v1248_v63 }
 0x150   : > { %2343 = vmatpush3.bf16.msra.mxu1 %v2342_v49 }
 0x151   : > { %2345 = vmatprep.subr.bf16.mxu1 %v2344_v9  ;;  %v1224_v9 = vsub.f32 %v1222_v7, %v1209_v23  ;;  %v1336_v59 = vand.u32 4294901760, %v1335_v11 }
 0x152   : > { %2447 = vmatpush3.bf16.msra.mxu0 %v3069_v28  ;;  %v1254_v28 = vand.u32 4294901760, %v3224_v16 }
 0x153   : > { %2449 = vmatprep.subr.bf16.mxu0 %v3075_v6  ;;  %v3243_v6 = vsub.f32 %v3208_v0, %v1251_v45  ;;  %v1225_v30 = vand.u32 2147483647, %v1224_v9 }
 0x154   : > { %2347 = vmatpush3.bf16.msra.mxu1 %v2346_v12  ;;  %v3284_v12 = vsub.f32 %v3246_v40, %v1260_v47 }
 0x155   : > { %2349 = vmatprep.subr.bf16.mxu1 %v2348_v56  ;;  %v1348_v49 = vand.u32 4294901760, %v3243_v6  ;;  %v1215_v56 = vsub.f32 %v1213_v52, %v1207_v37  ;;  %v2732_v52 = vmov 0.0|0.0  }
 0x156   : > { %2451 = vmatpush3.bf16.msra.mxu0 %v3078_v22  ;;  %v1328_v22 = vsub.f32 %v3213_v53, %v1327_v38 }
 0x157   : > { %2453 = vmatprep.subr.bf16.mxu0 %v3086_v2  ;;  %v3264_v2 = vsub.f32 %v3224_v16, %v1254_v28  ;;  %v1216_v7 = vand.u32 2147483647, %v1215_v56 }
 0x158   : > { %2351 = vmatpush3.bf16.msra.mxu1 %v3090_v21  ;;  %v3269_v21 = vsub.f32 %v3227_v48, %v1257_v18  ;;  %v1329_v5 = vand.u32 4294901760, %v1328_v22  ;;  %v1369_v22 = vand.u32 4294901760, %v3284_v12 }
 0x159   : > { %2353 = vmatprep.subr.bf16.mxu1 %v3100_v41  ;;  %v1341_v41 = vand.u32 4294901760, %v3238_v27  ;;  %v1355_v31 = vand.u32 4294901760, %v3264_v2 }
 0x15a   : > { %2455 = vmatpush3.bf16.msra.mxu0 %v3092_v17  ;;  %v1362_v17 = vand.u32 4294901760, %v3269_v21 }
 0x15b   : > { %2457 = vmatprep.subr.bf16.mxu0 %v3102_v19  ;;  %v1342_v19 = vsub.f32 %v3238_v27, %v1341_v41  ;;  %v1356_v37 = vsub.f32 %v3264_v2, %v1355_v31 }
 0x15c   : > { %2355 = vmatpush3.bf16.msra.mxu1 %v3106_v60  ;;  %v1349_v60 = vsub.f32 %v3243_v6, %v1348_v49  ;;  %v1363_v23 = vsub.f32 %v3269_v21, %v1362_v17 }
 0x15d   : > { %2357 = vmatprep.subr.bf16.mxu1 %v3116_v44  ;;  %v3296_v44 = vsub.f32 %v3250_v20, %v1263_v50  ;;  %v1357_v9 = vand.u32 4294901760, %v1356_v37 }
 0x15e   : > { %2459 = vmatpush3.bf16.msra.mxu0 %v3108_v10  ;;  %v2509_v10 = vpack.c.bf16 %v1336_v59, %v1329_v5  ;;  %v1350_v11 = vand.u32 4294901760, %v1349_v60  ;;  %v1370_v5 = vsub.f32 %v3284_v12, %v1369_v22  ;;  %v1364_v56 = vand.u32 4294901760, %v1363_v23 }
 0x15f   : > { %2461 = vmatprep.subr.bf16.mxu0 %v3118_v36  ;;  %v1343_v36 = vand.u32 4294901760, %v1342_v19  ;;  %v2734_v60 = vmov 0.0  }
 0x160   : > { %2359 = vmatpush3.bf16.msra.mxu1 %v3122_v15  ;;  %v1376_v15 = vand.u32 4294901760, %v3296_v44 }
 0x161   : > { %2361 = vmatprep.subr.bf16.mxu1 %v3130_v3  ;;  %v1226_v3 = vsub.f32 1.0, %v1225_v30  ;;  %v2512_v59 = vpack.c.bf16 %v1350_v11, %v1343_v36  ;;  %v2515_v30 = vpack.c.bf16 %v1364_v56, %v1357_v9  ;;  %v2521_v11 = vpack.c.bf16 %v3218_v13, %v3213_v53  ;;  %v3531_v56 = vld [vmem:[#allocation7_spill] sm:$0xff] }
 0x162   : > { %2463 = vmatpush3.bf16.msra.mxu0 %v3124_v1  ;;  %v1217_v1 = vsub.f32 1.0, %v1216_v7  ;;  %v1377_v19 = vsub.f32 %v3296_v44, %v1376_v15  ;;  %v3528_v7 = vand.u32 4294901760, %v3159_v51  ;;  %v2524_v51 = vpack.c.bf16 %v3243_v6, %v3238_v27 }
 0x163   : > { %2508 = vmatprep.subr.bf16.mxu0 %v2732_v52  ;;  %v2527_v9 = vpack.c.bf16 %v3269_v21, %v3264_v2 }
 0x164   : > { %2363 = vmatpush3.bf16.msra.mxu1 %v3133_v61  ;;  %v1227_v61 = vmax.f32 %v1226_v3, 0.0  ;;  %v1378_v37 = vand.u32 4294901760, %v1377_v19  ;;  %v3532_v19 = vld [vmem:[#allocation8_spill] sm:$0xff] }
 0x165   : > { %1090 = vmatmul.mubr.f32.vlgmr.msra.gmra.mrb[2].mxu0 %v3153_v35  ;;  %2365 = vmatprep.subr.bf16.mxu1 %v3135_v62  ;;  %v1218_v62 = vmax.f32 %v1217_v1, 0.0  ;;  %v3530_v1 = vld [vmem:[#allocation6_spill] sm:$0xff] }
 0x166   : > { %2510 = vmatpush3.bf16.msra.mxu0 %v2509_v10  ;;  %2225 = vmatprep.mubr.msk.f32.mxu0 %vm2733_vm0, %v2734_v60  ;;  %v1371_v10 = vand.u32 4294901760, %v1370_v5  ;;  %v3529_v5 = vld [vmem:[#allocation5_spill] sm:$0xff] }
 0x167   : > { %2511 = vmatprep.subr.bf16.mxu0 %v2732_v52  ;;  %v1228_v23 = vmul.f32 %v1227_v61, %v1218_v62  ;;  %v2497_v61 = vpack.c.bf16 %v1245_v42, %v1242_v54  ;;  %v2503_v54 = vpack.c.bf16 %v1257_v18, %v1254_v28  ;;  %v3536_v42 = vand.u32 4294901760, %v3162_v24 }
 0x168   : > { %2367 = vmatpush3.bf16.msra.mxu1 %v3137_v58  ;;  %v2518_v58 = vpack.c.bf16 %v1378_v37, %v1371_v10  ;;  %v3534_v10 = vld [vmem:[#allocation10_spill] sm:$0xff] }
 0x169   : > { %2401 = vmatprep.subr.bf16.mxu1 %v2869_v32  ;;  %v1239_v36 = vsel %vm1237_vm1, %v1228_v23, 0 }
 0x16a   : > { %2513 = vmatpush3.bf16.msra.mxu0 %v2512_v59  ;;  %v3336_v3 = vand.u32 4294901760, %v1239_v36  ;;  %v2530_v59 = vpack.c.bf16 %v3296_v44, %v3284_v12  ;;  %v2647_v44 = vld [vmem:[%s2821_s30] sm:$0xff]  ;;  %s2737_s30 = smov [#allocation2]  }
 0x16b   : > { %676 = vmatmul.mubr.f32.vlgmr.msra.gmra.mrb[2].mxu1 %v3153_v35  ;;  %2514 = vmatprep.subr.bf16.mxu0 %v2732_v52  ;;  %s2652_s9 = sshll.u32 %s2737_s30, 4  ;;  %s2653_s9 = int_to_ptr.vmem [resolvable:$false] %s2652_s9 }
 0x16c   : > { %2403 = vmatpush3.bf16.msra.mxu1 %v2871_v33  ;;  %918 = vmatprep.mubr.f32.mxu1 %v3528_v7  ;;  %v3364_v62 = vsub.f32 %v1239_v36, %v3336_v3  ;;  %s2654_s10 = scalar_lea.vmem %s2653_s9, 256  ;;  %p2655_p1 = scmp.lt.s32.totalorder %s3454_s4, %s2653_s9 }
 0x16d   : > { %2405 = vmatprep.subr.bf16.mxu1 %v2890_v43  ;;  %p2656_p2 = scmp.lt.s32.totalorder %s2654_s10, %s2648_s8 }
 0x16e   : > { %2516 = vmatpush3.bf16.msra.mxu0 %v2515_v30  ;;  %v3533_v30 = vld [vmem:[#allocation9_spill] sm:$0xff] }
 0x16f   : > { %2517 = vmatprep.subr.bf16.mxu0 %v2732_v52  ;;  %p2657_p3 = por %p2656_p2, %p2655_p1 }
 0x170   : > { %2407 = vmatpush3.bf16.msra.mxu1 %v2900_v46 }
 0x171   : > { %2409 = vmatprep.subr.bf16.mxu1 %v2951_v55  ;;  %p2658_p5 = pnand %p2657_p3, %p2651_p0 }
 0x172   : > { %2519 = vmatpush3.bf16.msra.mxu0 %v2518_v58 }
 0x173   : > { %2520 = vmatprep.subr.bf16.mxu0 %v2732_v52 }
 0x174   : > { %2411 = vmatpush3.bf16.msra.mxu1 %v2957_v57 }
 0x175   : > { %2226 = vmatmul.mubr.f32.vlgmr.msra.gmra.mrb[4].mxu0 %v3336_v3  ;;  %2413 = vmatprep.subr.bf16.mxu1 %v2985_v4 }
 0x176   : > { %2522 = vmatpush3.bf16.msra.mxu0 %v2521_v11  ;;  %2244 = vmatprep.mubr.msk.f32.mxu0 %vm2733_vm0, %v2734_v60 }
 0x177   : > { %2523 = vmatprep.subr.bf16.mxu0 %v2732_v52 }
 0x178   : > { %2415 = vmatpush3.bf16.msra.mxu1 %v2992_v8 }
 0x179   : > { %2417 = vmatprep.subr.bf16.mxu1 %v3009_v29 }
 0x17a   : > { %2525 = vmatpush3.bf16.msra.mxu0 %v2524_v51 }
 0x17b   : > { %2526 = vmatprep.subr.bf16.mxu0 %v2732_v52 }
 0x17c   : > { %2419 = vmatpush3.bf16.msra.mxu1 %v3529_v5 }
 0x17d   : > { %2421 = vmatprep.subr.bf16.mxu1 %v3530_v1 }
 0x17e   : > { %2528 = vmatpush3.bf16.msra.mxu0 %v2527_v9 }
 0x17f   : > { %2529 = vmatprep.subr.bf16.mxu0 %v2732_v52 }
 0x180   : > { %2423 = vmatpush3.bf16.msra.mxu1 %v3531_v56 }
 0x181   : > { %2425 = vmatprep.subr.bf16.mxu1 %v3532_v19 }
 0x182   : > { %2531 = vmatpush3.bf16.msra.mxu0 %v2530_v59 }
 0x183   : > { %2532 = vmatprep.subr.bf16.mxu0 %v2732_v52 }
 0x184   : > { %2427 = vmatpush3.bf16.msra.mxu1 %v3533_v30 }
 0x185   : > { %2245 = vmatmul.mubr.f32.vlgmr.msra.gmra.mrb[4].mxu0 %v3364_v62  ;;  %2429 = vmatprep.subr.bf16.mxu1 %v3534_v10 }
 0x186   : > { %2534 = vmatpush3.bf16.msra.mxu0 %v2497_v61  ;;  %2263 = vmatprep.mubr.msk.f32.mxu0 %vm2733_vm0, %v2734_v60 }
 0x187   : > { %2535 = vmatprep.subr.bf16.mxu0 %v2732_v52 }
 0x188   : > { %2431 = vmatpush3.bf16.msra.mxu1 %v3535_v39 }
 0x189   : > { %2465 = vmatprep.subr.bf16.mxu1 %v2869_v32  ;;  %v2506_v32 = vpack.c.bf16 %v1263_v50, %v1260_v47 }
 0x18a   : > { %2537 = vmatpush3.bf16.msra.mxu0 %v2500_v25 }
 0x18b   : > { %922 = vmatmul.mubr.f32.vlgmr.msra.gmra.mrb[4].mxu1 %v3536_v42  ;;  %2538 = vmatprep.subr.bf16.mxu0 %v2732_v52 }
 0x18c   : > { %2467 = vmatpush3.bf16.msra.mxu1 %v2871_v33  ;;  %1192 = vmatprep.mubr.f32.mxu1 %v3151_v26  ;;  %v2545_v33 = vpack.c.bf16 %v1334_v14, %v1327_v38 }
 0x18d   : > { %2469 = vmatprep.subr.bf16.mxu1 %v2890_v43  ;;  %v1316_v43 = vand.u32 4294901760, %v3364_v62 }
 0x18e   : > { %2540 = vmatpush3.bf16.msra.mxu0 %v2503_v54 }
 0x18f   : > { %2541 = vmatprep.subr.bf16.mxu0 %v2732_v52 }
 0x190   : > { %2471 = vmatpush3.bf16.msra.mxu1 %v2900_v46  ;;  %v2548_v46 = vpack.c.bf16 %v1348_v49, %v1341_v41 }
 0x191   : > { %2473 = vmatprep.subr.bf16.mxu1 %v2951_v55  ;;  %v2551_v55 = vpack.c.bf16 %v1362_v17, %v1355_v31 }
 0x192   : > { %2543 = vmatpush3.bf16.msra.mxu0 %v2506_v32 }
 0x193   : > { %2544 = vmatprep.subr.bf16.mxu0 %v2732_v52 }
 0x194   : > { %2475 = vmatpush3.bf16.msra.mxu1 %v2957_v57  ;;  %v2554_v57 = vpack.c.bf16 %v1376_v15, %v1369_v22 }
 0x195   : > { %2264 = vmatmul.mubr.f32.vlgmr.msra.gmra.mrb[4].mxu0 %v1316_v43  ;;  %2477 = vmatprep.subr.bf16.mxu1 %v2985_v4  ;;  %v1317_v4 = vsub.f32 %v3364_v62, %v1316_v43 }
 0x196   : > { %2546 = vmatpush3.bf16.msra.mxu0 %v2545_v33  ;;  %2282 = vmatprep.mubr.msk.f32.mxu0 %vm2733_vm0, %v2734_v60 }
 0x197   : > { %2547 = vmatprep.subr.bf16.mxu0 %v2732_v52 }
 0x198   : > { %2479 = vmatpush3.bf16.msra.mxu1 %v2992_v8  ;;  %v1318_v8 = vand.u32 4294901760, %v1317_v4 }
 0x199   : > { %2481 = vmatprep.subr.bf16.mxu1 %v3009_v29 }
 0x19a   : > { %2549 = vmatpush3.bf16.msra.mxu0 %v2548_v46 }
 0x19b   : > { %2550 = vmatprep.subr.bf16.mxu0 %v2732_v52 }
 0x19c   : > { %2483 = vmatpush3.bf16.msra.mxu1 %v3529_v5 }
 0x19d   : > { %2485 = vmatprep.subr.bf16.mxu1 %v3530_v1 }
 0x19e   : > { %2552 = vmatpush3.bf16.msra.mxu0 %v2551_v55 }
 0x19f   : > { %2553 = vmatprep.subr.bf16.mxu0 %v2732_v52 }
 0x1a0   : > { %2487 = vmatpush3.bf16.msra.mxu1 %v3531_v56 }
 0x1a1   : > { %2489 = vmatprep.subr.bf16.mxu1 %v3532_v19 }
 0x1a2   : > { %2555 = vmatpush3.bf16.msra.mxu0 %v2554_v57 }
 0x1a3   : > { %2556 = vmatprep.subr.bf16.mxu0 %v2732_v52 }
 0x1a4   : > { %2491 = vmatpush3.bf16.msra.mxu1 %v3533_v30 }
 0x1a5   : > { %2283 = vmatmul.mubr.f32.vlgmr.msra.gmra.mrb[4].mxu0 %v3336_v3  ;;  %2493 = vmatprep.subr.bf16.mxu1 %v3534_v10 }
 0x1a6   : > { %2558 = vmatpush3.bf16.msra.mxu0 %v2497_v61  ;;  %2301 = vmatprep.mubr.msk.f32.mxu0 %vm2733_vm0, %v2734_v60 }
 0x1a7   : > { %2559 = vmatprep.subr.bf16.mxu0 %v2732_v52 }
 0x1a8   : > { %2495 = vmatpush3.bf16.msra.mxu1 %v3535_v39 }
 0x1a9   : > { %2496 = vmatprep.subr.bf16.mxu1 %v2732_v52 }
 0x1aa   : > { %2561 = vmatpush3.bf16.msra.mxu0 %v2500_v25 }
 0x1ab   : > { %1194 = vmatmul.mubr.f32.vlgmr.msra.gmra.mrb[6].mxu1 %v3153_v35  ;;  %2562 = vmatprep.subr.bf16.mxu0 %v2732_v52 }
 0x1ac   : > { %2498 = vmatpush3.bf16.msra.mxu1 %v2497_v61  ;;  %2206 = vmatprep.mubr.msk.f32.mxu1 %vm2733_vm0, %v2734_v60 }
 0x1ad   : > { %2499 = vmatprep.subr.bf16.mxu1 %v2732_v52 }
 0x1ae   : > { %2564 = vmatpush3.bf16.msra.mxu0 %v2503_v54 }
 0x1af   : > { %2565 = vmatprep.subr.bf16.mxu0 %v2732_v52 }
 0x1b0   : > { %2501 = vmatpush3.bf16.msra.mxu1 %v2500_v25 }
 0x1b1   : > { %2502 = vmatprep.subr.bf16.mxu1 %v2732_v52 }
 0x1b2   : > { %2567 = vmatpush3.bf16.msra.mxu0 %v2506_v32 }
 0x1b4   : > { %2504 = vmatpush3.bf16.msra.mxu1 %v2503_v54 }
 0x1b5   : > { %2302 = vmatmul.mubr.f32.vlgmr.msra.gmra.mrb[4].mxu0 %v3336_v3  ;;  %2505 = vmatprep.subr.bf16.mxu1 %v2732_v52 }
 0x1b8   : > { %2507 = vmatpush3.bf16.msra.mxu1 %v2506_v32 }
 0x1bb   : > { %2207 = vmatmul.mubr.f32.vlgmr.msra.gmra.mrb[8].mxu1 %v1318_v8 }
 0x218   : > { %v2028_v29 = vpop.f32.mrb[0].mxu0 }
 0x219   : > { %v2029_v26 = vpop.f32.mrb[1].mxu0 }
 0x21a   : > { %v2030_v35 = vadd.f32 %v2029_v26, %v2028_v29 }
 0x21e   : > { %v1958_v24 = vpop.f32.mrb[0].mxu1 }
 0x21f   : > { %v1959_v34 = vpop.f32.mrb[1].mxu1 }
 0x220   : > { %v1960_v0 = vadd.f32 %v1959_v34, %v1958_v24 }
 0x238   : > { %v2098_v53 = vpop.f32.mrb[2].mxu0 }
 0x239   : > { %v2099_v13 = vpop.f32.mrb[3].mxu0 }
 0x23a   : > { %v2100_v63 = vadd.f32 %v2099_v13, %v2098_v53 }
 0x23e   : > { %v1993_v45 = vpop.f32.mrb[2].mxu1 }
 0x23f   : > { %v1994_v16 = vpop.f32.mrb[3].mxu1 }
 0x240   : > { %v1995_v48 = vadd.f32 %v1994_v16, %v1993_v45 }
 0x242   : > { %v678_v38 = vadd.f32 %v1995_v48, %v1960_v0 }
 0x244   : > { %v816_v14 = vadd.f32 %v2030_v35, %v678_v38 }
 0x25e   : > { %v2063_v28 = vpop.f32.mrb[4].mxu1 }
 0x25f   : > { %v2064_v18 = vpop.f32.mrb[5].mxu1 }
 0x260   : > { %v2065_v27 = vadd.f32 %v2064_v18, %v2063_v28 }
 0x262   : > { %v924_v6 = vadd.f32 %v2065_v27, %v816_v14 }
 0x264   : > { %v1092_v40 = vadd.f32 %v2100_v63, %v924_v6 }
 0x27e   : > { %v2133_v20 = vpop.f32.mrb[6].mxu1 }
 0x27f   : > { %v2134_v2 = vpop.f32.mrb[7].mxu1 }
 0x280   : > { %v2135_v21 = vadd.f32 %v2134_v2, %v2133_v20 }
 0x282   : > { %v1196_v47 = vadd.f32 %v2135_v21, %v1092_v40 }
 0x284   : > { %1779 = vrot.lane.b32.xlu1 %v1196_v47, %s2735_s21 }
 0x288   : > { %v1774_v41 = vpop.f32.mrb[4].mxu0 }
 0x289   : > { %v2303_v49 = vpop.f32.mrb[5].mxu0 }
 0x28e   : > { %v1320_v50 = vpop.f32.mrb[8].mxu1 }
 0x28f   : > { %v2568_v31 = vadd.f32 %v1774_v41, %v1320_v50  ;;  %v2208_v17 = vpop.f32.mrb[9].mxu1 }
 0x291   : > { %1783 = vrot.lane.b32.xlu0 %v2568_v31, %s2736_s23 }
 0x2f6   : > { %v1780_v12 = vpop.permute.xlu1 %1779 }
 0x2f7   : > { %v1787_v22 = vsel %vm1786_vm2, %v2647_v44, %v1780_v12 }
 0x303   : > { %v1784_v15 = vpop.permute.xlu0 %1783 }
 0x304   : > { %v1789_v52 = vsel %vm1788_vm3, %v1787_v22, %v1784_v15 }
 0x305   : > { %v1791_v60 = vsel %vm1790_vm4, %v1789_v52, 0.0 }
 0x306   : > { %1792 = vst [vmem:[%s213_s29] sm:$0xff] %v1791_v60 }
 0x307   : > { %2661 = shalt.err (!%p2658_p5)
}
 0x308   : > { %s2662_s11 = scalar_lea.hbm %s3452_s7, 128  ;;  %s2666_s21 = scalar_lea.hbm %s3502_s3, 256 }
 0x309   : > { %p2663_p6 = scmp.ne.s32.totalorder %s3452_s7, %s2662_s11  ;;  %p2667_p10 = scmp.lt.u32.totalorder %s3452_s7, %s3502_s3 }
 0x30a   : > { %p2668_p11 = scmp.lt.u32.totalorder %s2666_s21, %s2662_s11  ;;  %p2670_p13 = scmp.lt.u32.totalorder %s2662_s11, %s3452_s7 }
 0x30b   : > { %p2664_p7 = pnand %p2663_p6, %p2798_p4 }
 0x30c   : > { %p2669_p12 = por %p2668_p11, %p2667_p10 }
 0x30d   : > { %p2665_p9 = pneg %p2664_p7 }
 0x30e   : > { %p2671_p0 = por %p2670_p13, %p2669_p12 }
 0x310   : > { %p2672_p1 = pnand %p2671_p0, %p2665_p9 }
 0x312   : > { %2675 = shalt.err (!%p2672_p1)
}
 0x313   : > { %2577 = dma.vmem_to_hbm [thread:$0]  (%p2798_p4), %s3454_s4, 128, %s3452_s7, %s1794_s15  }
 0x314 PF: > { %p2583_p2 = scmp.ge.s32.totalorder %s2726_s17, 2  ;;  %s1820_s27 = sand.u32 1, %s2706_s12  }
 0x315   : > { %s1821_s28 = scalar_lea.sflag [#allocation3], %s1820_s27 }
 0x316   : > { %p2580_p3 = pnand %p2583_p2, %p2805_p8 }
 0x318   : > { %2701 = dma.done.wait (!%p2580_p3), %s1821_s28, 128  }
 0x319   : > { %2703 = vsyncadd (!%p2580_p3), %s1821_s28, 4294967168  ;;  %s16_s17 = sadd.s32 1, %s2726_s17   ;;  %s3537_s12 = smov %s2710_s13 }
 0x31a   : > { %p13_p5 = scmp.ge.s32.totalorder %s16_s17, 4   ;;  %s3538_s13 = smov %s2714_s14 }
 0x31b   : > { %s3539_s14 = smov %s2811_s25  ;;  %s3540_s15 = smov %s2722_s16 }
 0x31c   : > { %s3541_s16 = smov %s3543_s20  ;;  %15 = sbr.rel (!%p13_p5) target bundleno = 4 (0x4), region = 73 }
 0x323   :  { %1826 = vsyncpa [#allocation3], 1 }
 0x324   :  { %1828 = vsyncpa [#allocation3 + $0x1], 1 }

</bundles_post_ra>
